<compile_context>
chip_gen: v7x
topology: tpu7x:2x2x1
jax: 0.10.0
libtpu: 0.0.40
codegen_flags: <defaults>
</compile_context>

<pallas_src>
import jax
import jax.numpy as jnp
from jax.experimental import pallas as pl
from jax.experimental.pallas import tpu as pltpu


def _rope_cache_kernel_full(inv_ref, cos_ref, sin_ref):
    # inv_ref: (1, dim) f32, already laid out as [inv_freq, inv_freq].
    # cos_ref / sin_ref: (TILE_S, dim) block in the output dtype.
    S, D = cos_ref.shape
    row0 = pl.program_id(0) * S
    # Position index. float32 is exact up to 2^24 (~16.7M positions), which is
    # far beyond realistic seq_len.
    t = (jax.lax.broadcasted_iota(jnp.int32, (S, D), 0) + row0).astype(jnp.float32)
    emb = t * inv_ref[...]                       # outer product via broadcast
    cos_ref[...] = jnp.cos(emb).astype(cos_ref.dtype)
    sin_ref[...] = jnp.sin(emb).astype(sin_ref.dtype)


def _rope_cache_kernel_half(inv_ref, cos_ref, sin_ref):
    # inv_ref: (1, dim//2) f32.  Compute cos/sin once on the half-width block
    # (still lane-dense: dim//2 % 128 == 0) and store into both halves of the
    # output, halving EUP (transcendental) work.
    S, D = cos_ref.shape
    H = D // 2
    row0 = pl.program_id(0) * S
    t = (jax.lax.broadcasted_iota(jnp.int32, (S, H), 0) + row0).astype(jnp.float32)
    emb = t * inv_ref[...]
    c = jnp.cos(emb).astype(cos_ref.dtype)
    s = jnp.sin(emb).astype(sin_ref.dtype)
    cos_ref[:, :H] = c
    cos_ref[:, H:] = c
    sin_ref[:, :H] = s
    sin_ref[:, H:] = s


# Memoized caches, mirroring the torch module's cos_cached / sin_cached.
_ROPE_CACHE = {}


def _build_rope_cache(seq_len, dim, base, out_dtype):
    key = (int(seq_len), int(dim), float(base), jnp.dtype(out_dtype).name)
    hit = _ROPE_CACHE.get(key)
    if hit is not None:
        return hit

    half = dim // 2
    inv_freq = 1.0 / (base ** (jnp.arange(0, dim, 2, dtype=jnp.float32) / dim))

    # Seq-axis tiling: modest tiles (512 rows) keep VMEM small, amortize the
    # ~0.35 us/step grid overhead, and let the default double-buffering hide
    # the HBM writeback of both outputs.
    TILE_S = 512
    tile_s = seq_len if seq_len <= TILE_S else TILE_S
    grid = (pl.cdiv(seq_len, tile_s),)

    # Half-width EUP path only when the half is itself lane-dense.
    use_half = (half >= 128) and (half % 128 == 0)
    if use_half:
        kernel = _rope_cache_kernel_half
        inv_in = inv_freq.reshape(1, half)
        in_width = half
    else:
        kernel = _rope_cache_kernel_full
        # Fold cat((freqs, freqs), -1) into a duplicated frequency row.
        inv_in = jnp.concatenate([inv_freq, inv_freq], axis=-1).reshape(1, dim)
        in_width = dim

    cos2d, sin2d = pl.pallas_call(
        kernel,
        grid=grid,
        out_shape=(
            jax.ShapeDtypeStruct((seq_len, dim), out_dtype),
            jax.ShapeDtypeStruct((seq_len, dim), out_dtype),
        ),
        in_specs=[pl.BlockSpec((1, in_width), lambda i: (0, 0))],
        out_specs=(
            pl.BlockSpec((tile_s, dim), lambda i: (i, 0)),
            pl.BlockSpec((tile_s, dim), lambda i: (i, 0)),
        ),
        compiler_params=pltpu.CompilerParams(
            dimension_semantics=("parallel",),   # shard seq tiles across TCs (v7x)
        ),
    )(inv_in)

    # [seq_len, 1, dim] like cos_cached[:, None, :] (metadata-only reshape).
    out = (cos2d[:, None, :], sin2d[:, None, :])
    _ROPE_CACHE[key] = out
    return out


def sat_rotary_embedding(x, dim, base=10000.0, seq_dim=1, seq_len=None):
    """Returns (cos_cached, sin_cached) with shape [seq_len, 1, dim], dtype x.dtype."""
    if seq_len is None:
        seq_len = x.shape[seq_dim]
    return _build_rope_cache(seq_len, dim, base, x.dtype)


def _reference(x, dim, base=10000.0, seq_dim=1):
    seq_len = x.shape[seq_dim]
    inv_freq = 1.0 / (base ** (jnp.arange(0, dim, 2, dtype=jnp.float32) / dim))
    t = jnp.arange(seq_len, dtype=jnp.float32)
    freqs = jnp.einsum("i,j->ij", t, inv_freq)
    emb = jnp.concatenate([freqs, freqs], axis=-1)
    cos = jnp.cos(emb)[:, None, :].astype(x.dtype)
    sin = jnp.sin(emb)[:, None, :].astype(x.dtype)
    return cos, sin


if __name__ == "__main__":
    key = jax.random.PRNGKey(0)

    # Small test shapes consistent with the module (x: (batch, seq, hidden), seq_dim=1).
    batch, seq, hidden = 2, 8, 32
    dim = hidden
    x = jax.random.normal(key, (batch, seq, hidden), dtype=jnp.float32).astype(jnp.bfloat16)

    cos, sin = sat_rotary_embedding(x, dim=dim, base=10000.0, seq_dim=1)
    cos, sin = jax.block_until_ready((cos, sin))

    cos_ref, sin_ref = _reference(x, dim=dim)
    assert cos.shape == (seq, 1, dim) and sin.shape == (seq, 1, dim)
    assert cos.dtype == x.dtype and sin.dtype == x.dtype
    assert jnp.allclose(cos.astype(jnp.float32), cos_ref.astype(jnp.float32), atol=1e-2)
    assert jnp.allclose(sin.astype(jnp.float32), sin_ref.astype(jnp.float32), atol=1e-2)

    # Exercise the tiled path (grid > 1) and the half-width EUP path (dim=256)
    # at a longer sequence length, in float32 for a tight check.
    seq_long, dim_long = 2048 + 40, 256   # non-multiple of tile -> padded last tile
    x_long = jnp.zeros((1, seq_long, dim_long), dtype=jnp.float32)
    cos_l, sin_l = sat_rotary_embedding(x_long, dim=dim_long)
    cos_l, sin_l = jax.block_until_ready((cos_l, sin_l))
    cos_lr, sin_lr = _reference(x_long, dim=dim_long)
    assert cos_l.shape == (seq_long, 1, dim_long)
    assert jnp.allclose(cos_l, cos_lr, atol=1e-5)
    assert jnp.allclose(sin_l, sin_lr, atol=1e-5)

    print("KERNEL_OK")
</pallas_src>

<mosaic_0001>
module attributes {stable_mosaic.version = 11 : i64} {
  func.func @_rope_cache_kernel_full(%arg0: i32, %arg1: memref<1x32xf32, #tpu.memory_space<vmem>>, %arg2: memref<8x32xbf16, #tpu.memory_space<vmem>>, %arg3: memref<8x32xbf16, #tpu.memory_space<vmem>>) attributes {dimension_semantics = [#tpu.dimension_semantics<parallel>], iteration_bounds = array<i64: 1>, scalar_prefetch = 0 : i64, scratch_operands = 0 : i64, tpu.core_type = #tpu.core_type<tc>, window_params = [{pipeline_mode = #tpu.pipeline_mode<synchronous>, transform_indices = @transform_0, window_bounds = array<i64: 1, 32>}, {transform_indices = @transform_1, window_bounds = array<i64: 8, 32>}, {transform_indices = @transform_2, window_bounds = array<i64: 8, 32>}]} {
    %c8_i32 = arith.constant 8 : i32
    %0 = arith.muli %arg0, %c8_i32 : i32
    %1 = tpu.iota {dimensions = array<i32: 0>} : vector<8x32xi32>
    %2 = vector.broadcast %0 : i32 to vector<8x32xi32>
    %3 = arith.addi %1, %2 : vector<8x32xi32>
    %4 = arith.sitofp %3 : vector<8x32xi32> to vector<8x32xf32>
    %c0 = arith.constant 0 : index
    %c0_0 = arith.constant 0 : index
    %5 = vector.load %arg1[%c0, %c0_0] : memref<1x32xf32, #tpu.memory_space<vmem>>, vector<1x32xf32>
    %6 = vector.broadcast %5 : vector<1x32xf32> to vector<8x32xf32>
    %7 = arith.mulf %4, %6 : vector<8x32xf32>
    %8 = math.cos %7 : vector<8x32xf32>
    %9 = arith.truncf %8 : vector<8x32xf32> to vector<8x32xbf16>
    %c0_1 = arith.constant 0 : index
    %c0_2 = arith.constant 0 : index
    %10 = vector.load %arg2[%c0_1, %c0_2] : memref<8x32xbf16, #tpu.memory_space<vmem>>, vector<8x32xbf16>
    tpu.vector_store %arg2[%c0_1, %c0_2], %9 {strides = array<i32>} : memref<8x32xbf16, #tpu.memory_space<vmem>>, vector<8x32xbf16>,
    %11 = math.sin %7 : vector<8x32xf32>
    %12 = arith.truncf %11 : vector<8x32xf32> to vector<8x32xbf16>
    %c0_3 = arith.constant 0 : index
    %c0_4 = arith.constant 0 : index
    %13 = vector.load %arg3[%c0_3, %c0_4] : memref<8x32xbf16, #tpu.memory_space<vmem>>, vector<8x32xbf16>
    tpu.vector_store %arg3[%c0_3, %c0_4], %12 {strides = array<i32>} : memref<8x32xbf16, #tpu.memory_space<vmem>>, vector<8x32xbf16>,
    return
  }
  func.func @transform_0(%arg0: i32) -> (i32, i32) {
    %c0_i32 = arith.constant 0 : i32
    %c0_i32_0 = arith.constant 0 : i32
    %c0_i32_1 = arith.constant 0 : i32
    return %c0_i32, %c0_i32_0 : i32, i32
  }
  func.func @transform_1(%arg0: i32) -> (i32, i32) {
    %c0_i32 = arith.constant 0 : i32
    %c0_i32_0 = arith.constant 0 : i32
    return %arg0, %c0_i32 : i32, i32
  }
  func.func @transform_2(%arg0: i32) -> (i32, i32) {
    %c0_i32 = arith.constant 0 : i32
    %c0_i32_0 = arith.constant 0 : i32
    return %arg0, %c0_i32 : i32, i32
  }
}

</mosaic_0001>

<bundles_post_ra>
// kernel: tpu_custom_call.1
= control target key start
LH: loop header
LB: loop body
LE: loop exit
PB: predicated region body
PF: predicated region fallthrough
CT: control target
= control target key end

     0   :  { %8 = vsyncpa [#allocation3], 0  ;;  %s458_s0 = inlined_call_operand.hbm [shape: f32[1,32], index: 0, kind: input, shape index: {}]   ;;  %s459_s1 = inlined_call_operand.hbm [shape: bf16[8,32], index: 1, kind: output, shape index: {0}]   ;;  %s460_s2 = inlined_call_operand.hbm [shape: bf16[8,32], index: 2, kind: output, shape index: {1}]  }
   0x1   :  { %9 = vsyncpa [#allocation4], 0 }
   0x2   :  { %10 = vsyncpa [#allocation7], 0  ;;  %s377_s9 = smov [#allocation2]   ;;  %s305_s13 = scalar_lea.hbm %s458_s0, 16 }
   0x3   :  { %s17_s10 = sshll.u32 %s377_s9, 4  ;;  %p306_p0 = scmp.ne.s32.totalorder %s458_s0, %s305_s13  ;;  %s18_s10 = int_to_ptr.vmem [resolvable:$true] %s17_s10 }
   0x4   :  { %p309_p1 = scmp.lt.u32.totalorder %s305_s13, %s458_s0 }
   0x6   :  { %p311_p2 = pnand %p309_p1, %p306_p0 }
   0x8   :  { %314 = shalt.err (!%p311_p2)
}
   0x9   :  { %s315_s18 = scalar_lea.vmem %s18_s10, 16  ;;  %s319_s19 = scalar_lea.vmem %s18_s10, 32 }
   0xa   :  { %p316_p3 = scmp.ne.s32.totalorder %s18_s10, %s315_s18  ;;  %p320_p4 = scmp.lt.s32.totalorder %s18_s10, %s18_s10 }
   0xb   :  { %p321_p5 = scmp.lt.s32.totalorder %s319_s19, %s315_s18 }
   0xd   :  { %p322_p6 = por %p321_p5, %p320_p4 }
   0xf   :  { %p323_p7 = pnand %p322_p6, %p316_p3 }
  0x11   :  { %326 = shalt.err (!%p323_p7)
}
  0x12   :  { %20 = dma.hbm_to_vmem [thread:$0]  %s458_s0, 16, %s18_s10, [#allocation3]  }
  0x13   :  { %371 = dma.done.wait [#allocation3], 16  }
  0x14   :  { %372 = vsyncadd [#allocation3], 4294967280  ;;  %v25_v0 = vlaneseq  ;;  %v279_v3 = vld [vmem:[#allocation2] ss:$0 sm:$0xff]  ;;  %v378_v16 = vmov 683565275  }
  0x15   :  { %v379_v18 = vmov 2475754826   ;;  %v380_v20 = vmov 2131351028   ;;  %v381_v22 = vmov 2102212464  }
  0x16   :  { %v26_v1 = vshrl.u32 %v25_v0, 7  ;;  %v382_v24 = vmov 920167782   ;;  %v383_v31 = vmov 1326507024   ;;  %s384_s0 = smov [#allocation5]  }
  0x17   :  { %s256_s22 = sshll.u32 %s384_s0, 4  ;;  %s385_s23 = smov [#allocation6]   ;;  %s257_s22 = int_to_ptr.vmem [resolvable:$true] %s256_s22 }
  0x18   :  { %v29_v2 = vcvt.s32.f32 %v26_v1  ;;  %s266_s24 = sshll.u32 %s385_s23, 4  ;;  %s327_s25 = scalar_lea.vmem %s257_s22, 64  ;;  %s267_s24 = int_to_ptr.vmem [resolvable:$true] %s266_s24 }
  0x19   :  { %p328_p8 = scmp.ne.s32.totalorder %s257_s22, %s327_s25  ;;  %p332_p9 = scmp.lt.s32.totalorder %s257_s22, %s257_s22 }
  0x1a   :  { %v413_v4 = vmul.f32 %v279_v3, %v29_v2  ;;  %p333_p10 = scmp.lt.s32.totalorder %s327_s25, %s327_s25 }
  0x1c   :  { %v41_v5 = vand.u32 2139095040, %v413_v4  ;;  %v38_v7 = vand.u32 2147483647, %v413_v4  ;;  %vm40_vm7 = vcmp.lt.s32.totalorder %v413_v4, 0  ;;  %vm130_vm15 = vweird.f32 %v413_v4  ;;  %p334_p11 = por %p333_p10, %p332_p9 }
  0x1e   :  { %v42_v6 = vshrl.u32 %v41_v5, 23  ;;  %v45_v10 = vand.u32 8388607, %v38_v7  ;;  %vm39_vm8 = vcmp.le.f32.partialorder %v38_v7, 0.7853982  ;;  %p335_p12 = pnand %p334_p11, %p328_p8 }
  0x20   :  { %v280_v8 = vadd.s32 4294967169, %v42_v6  ;;  %v46_v13 = vor.u32 8388608, %v45_v10 }
  0x22   :  { %v48_v9 = vadd.s32 1, %v280_v8  ;;  %v86_v33 = vshll.u32 %v46_v13, 8 }
  0x24   :  { %vm49_vm0 = vcmp.gt.s32.totalorder %v48_v9, 0 }
  0x25   :  { %v50_v11 = vsel %vm49_vm0, %v48_v9, 0  ;;  %vm142_vm0 = vcmask 257024  }
  0x26   :  { %v52_v12 = vand.u32 31, %v50_v11  ;;  %v51_v14 = vshrl.u32 %v50_v11, 5 }
  0x28   :  { %v53_v15 = vsub.s32 32, %v52_v12  ;;  %v55_v17 = vshll.u32 %v378_v16, %v52_v12  ;;  %v58_v19 = vshll.u32 %v379_v18, %v52_v12  ;;  %v61_v21 = vshll.u32 %v380_v20, %v52_v12 }
  0x29   :  { %v64_v23 = vshll.u32 %v381_v22, %v52_v12  ;;  %v67_v25 = vshll.u32 %v382_v24, %v52_v12  ;;  %vm70_vm1 = vcmp.lt.s32.totalorder %v51_v14, 1  ;;  %vm73_vm2 = vcmp.lt.s32.totalorder %v51_v14, 4 }
  0x2a   :  { %v54_v26 = vshrl.u32 %v378_v16, %v53_v15  ;;  %v56_v27 = vshrl.u32 %v379_v18, %v53_v15  ;;  %v59_v28 = vshrl.u32 %v380_v20, %v53_v15  ;;  %v62_v29 = vshrl.u32 %v381_v22, %v53_v15 }
  0x2b   :  { %v65_v30 = vshrl.u32 %v382_v24, %v53_v15  ;;  %v68_v32 = vshrl.u32 %v383_v31, %v53_v15  ;;  %vm71_vm3 = vcmp.lt.s32.totalorder %v51_v14, 2  ;;  %vm72_vm4 = vcmp.lt.s32.totalorder %v51_v14, 3 }
  0x2c   :  { %v57_v34 = vor.u32 %v56_v27, %v55_v17  ;;  %v60_v35 = vor.u32 %v59_v28, %v58_v19  ;;  %v63_v36 = vor.u32 %v62_v29, %v61_v21 }
  0x2d   :  { %v66_v37 = vor.u32 %v65_v30, %v64_v23  ;;  %v69_v38 = vor.u32 %v68_v32, %v67_v25 }
  0x2e   :  { %v74_v39 = vsel %vm70_vm1, %v54_v26, %v57_v34  ;;  %v75_v40 = vsel %vm73_vm2, %v63_v36, 2102212464  ;;  %v78_v41 = vsel %vm70_vm1, %v57_v34, %v60_v35  ;;  %v82_v42 = vsel %vm70_vm1, %v60_v35, %v63_v36 }
  0x2f   :  { %v76_v43 = vsel %vm72_vm4, %v60_v35, %v75_v40  ;;  %v79_v44 = vsel %vm73_vm2, %v66_v37, 920167782  ;;  %v83_v45 = vsel %vm73_vm2, %v69_v38, 1326507024 }
  0x30   :  { %v80_v46 = vsel %vm72_vm4, %v63_v36, %v79_v44  ;;  %v84_v47 = vsel %vm72_vm4, %v66_v37, %v83_v45  ;;  %v77_v48 = vsel %vm71_vm3, %v74_v39, %v76_v43 }
  0x31   :  { %v81_v49 = vsel %vm71_vm3, %v78_v41, %v80_v46  ;;  %v85_v50 = vsel %vm71_vm3, %v82_v42, %v84_v47  ;;  %v93_v55 = vmul.u32 %v86_v33, %v77_v48 }
  0x32   :  { %v419_v51 = vmul.u32.u64.low %v86_v33, %v85_v50  ;;  %v420_v52 = vmul.u32.u64.high %v86_v33, %v85_v50, %v419_v51  ;;  %v422_v53 = vmul.u32.u64.low %v86_v33, %v81_v49  ;;  %v423_v54 = vmul.u32.u64.high %v86_v33, %v81_v49, %v422_v53 }
  0x34   :  { %vm95_vm5 = vc.u32 %v420_v52, %v422_v53  ;;  %v96_v56 = vadd.s32 1, %v423_v54  ;;  %v94_v3 = vadd.s32 %v422_v53, %v420_v52 }
  0x36   :  { %v97_v57 = vsel %vm95_vm5, %v96_v56, %v423_v54 }
  0x37   :  { %v98_v58 = vadd.s32 %v97_v57, %v93_v55 }
  0x39   :  { %v99_v59 = vadd.s32 536870912, %v98_v58 }
  0x3b   :  { %v100_v60 = vshrl.u32 %v99_v59, 30 }
  0x3d   :  { %v101_v61 = vshll.u32 %v100_v60, 30  ;;  %v124_v17 = vsub.s32 4, %v100_v60 }
  0x3f   :  { %v102_v62 = vsub.s32 %v98_v58, %v101_v61  ;;  %v125_v20 = vsel %vm40_vm7, %v124_v17, %v100_v60 }
  0x40   :  { %v127_v23 = vsel %vm39_vm8, 0, %v125_v20 }
  0x41   :  { %v104_v63 = vsub.s32 0, %v102_v62  ;;  %v237_v24 = vadd.s32 3, %v127_v23  ;;  %v131_v25 = vand.u32 3, %v127_v23 }
  0x43   :  { %v281_v0 = vmin.u32 %v104_v63, %v102_v62  ;;  %v238_v26 = vand.u32 3, %v237_v24  ;;  %vm136_vm9 = vcmp.eq.s32.totalorder %v131_v25, 2  ;;  %vm133_vm11 = vcmp.eq.s32.totalorder %v131_v25, 0 }
  0x44   :  { %vm132_vm13 = vcmp.lt.s32.totalorder %v131_v25, 2 }
  0x45   :  { %v106_v1 = vclz %v281_v0  ;;  %vm243_vm10 = vcmp.eq.s32.totalorder %v238_v26, 2  ;;  %vm240_vm12 = vcmp.eq.s32.totalorder %v238_v26, 0  ;;  %vm239_vm14 = vcmp.lt.s32.totalorder %v238_v26, 2 }
  0x47   :  { %v282_v2 = vadd.s32 4294967294, %v106_v1 }
  0x49   :  { %vm283_vm6 = vcmp.lt.s32.totalorder %v282_v2, 0 }
  0x4a   :  { %v109_v5 = vsel %vm283_vm6, 0, %v282_v2 }
  0x4b   :  { %v110_v6 = vsub.s32 32, %v109_v5  ;;  %v111_v8 = vshll.u32 %v102_v62, %v109_v5  ;;  %v114_v9 = vsub.s32 4294967266, %v109_v5 }
  0x4d   :  { %v112_v10 = vshrl.u32 %v94_v3, %v110_v6  ;;  %v115_v11 = vadd.s32 127, %v114_v9 }
  0x4f   :  { %v113_v12 = vor.u32 %v112_v10, %v111_v8  ;;  %v116_v13 = vshll.u32 %v115_v11, 23 }
  0x51   :  { %v117_v14 = vor.u32 4788187, %v116_v13  ;;  %v120_v15 = vcvt.s32.f32 %v113_v12 }
  0x53   :  { %v118_v16 = vand.u32 2147483647, %v117_v14 }
  0x55   :  { %v121_v18 = vmul.f32 %v120_v15, %v118_v16 }
  0x57   :  { %v122_v19 = vxor.u32 2147483648, %v121_v18 }
  0x59   :  { %v123_v21 = vsel %vm40_vm7, %v122_v19, %v121_v18 }
  0x5a   :  { %v126_v22 = vsel %vm39_vm8, %v413_v4, %v123_v21 }
  0x5b   :  { %301 = vcosq.f32 %v126_v22 }
  0x5c   :  { %303 = vsinq.f32 %v126_v22 }
  0x65   :  { %v302_v27 = vpop.eup %301 }
  0x66   :  { %v304_v28 = vpop.eup %303  ;;  %v137_v29 = vxor.u32 2147483648, %v302_v27 }
  0x67   :  { %v134_v7 = vxor.u32 2147483648, %v304_v28 }
  0x68   :  { %v138_v30 = vsel %vm136_vm9, %v137_v29, %v304_v28  ;;  %v245_v31 = vsel %vm243_vm10, %v137_v29, %v304_v28 }
  0x69   :  { %v135_v32 = vsel %vm133_vm11, %v302_v27, %v134_v7  ;;  %v242_v33 = vsel %vm240_vm12, %v302_v27, %v134_v7 }
  0x6a   :  { %v139_v34 = vsel %vm132_vm13, %v135_v32, %v138_v30  ;;  %v246_v35 = vsel %vm239_vm14, %v242_v33, %v245_v31 }
  0x6b   :  { %v140_v36 = vsel %vm130_vm15, nan, %v139_v34  ;;  %v247_v37 = vsel %vm130_vm15, nan, %v246_v35 }
  0x6c   :  { %v141_v38 = vpack.c.bf16 %v140_v36, %v140_v36  ;;  %v248_v39 = vpack.c.bf16 %v247_v37, %v247_v37 }
  0x6e   :  { %143 = vst.msk [vmem:[#allocation5] sm:$0xf] %vm142_vm0, %v141_v38  ;;  %249 = vst.msk [vmem:[#allocation6] sm:$0xf] %vm142_vm0, %v248_v39 }
  0x6f   :  { %338 = shalt.err (!%p335_p12)
}
  0x70   :  { %s339_s28 = scalar_lea.hbm %s459_s1, 64 }
  0x71   :  { %p340_p13 = scmp.ne.s32.totalorder %s459_s1, %s339_s28  ;;  %p343_p0 = scmp.lt.u32.totalorder %s339_s28, %s459_s1 }
  0x73   :  { %p345_p1 = pnand %p343_p0, %p340_p13 }
  0x75   :  { %348 = shalt.err (!%p345_p1)
}
  0x76   :  { %259 = dma.vmem_to_hbm [thread:$0]  %s257_s22, 64, %s459_s1, [#allocation4]  }
  0x77   :  { %s349_s7 = scalar_lea.vmem %s267_s24, 64  ;;  %p354_p3 = scmp.lt.s32.totalorder %s267_s24, %s267_s24 }
  0x78   :  { %p350_p2 = scmp.ne.s32.totalorder %s267_s24, %s349_s7  ;;  %p355_p4 = scmp.lt.s32.totalorder %s349_s7, %s349_s7 }
  0x7a   :  { %p356_p5 = por %p355_p4, %p354_p3 }
  0x7c   :  { %p357_p6 = pnand %p356_p5, %p350_p2 }
  0x7e   :  { %360 = shalt.err (!%p357_p6)
}
  0x7f   :  { %s361_s10 = scalar_lea.hbm %s460_s2, 64 }
  0x80   :  { %p362_p7 = scmp.ne.s32.totalorder %s460_s2, %s361_s10  ;;  %p365_p8 = scmp.lt.u32.totalorder %s361_s10, %s460_s2 }
  0x82   :  { %p367_p9 = pnand %p365_p8, %p362_p7 }
  0x84   :  { %370 = shalt.err (!%p367_p9)
}
  0x85   :  { %269 = dma.vmem_to_hbm [thread:$0]  %s267_s24, 64, %s460_s2, [#allocation7]  }
  0x86   :  { %373 = dma.done.wait [#allocation4], 64  }
  0x87   :  { %374 = vsyncadd [#allocation4], 4294967232 }
  0x88   :  { %375 = dma.done.wait [#allocation7], 64  }
  0x89   :  { %376 = vsyncadd [#allocation7], 4294967232 }
  0x8a   :  { %276 = vsyncpa [#allocation3], 1 }
  0x8b   :  { %277 = vsyncpa [#allocation4], 1 }
  0x8c   :  { %278 = vsyncpa [#allocation7], 1 }

</bundles_post_ra>
